<compile_context>
chip_gen: v5e
topology: v5e:2x2
jax: 0.10.0
libtpu: 0.0.40
codegen_flags: <defaults>
</compile_context>

<pallas_src>
import functools
import math

import jax
import jax.numpy as jnp
from jax.experimental import pallas as pl
from jax.experimental.pallas import tpu as pltpu


# ----------------------------------------------------------------------------
# Kernels
# ----------------------------------------------------------------------------
def _add_pe_kernel(x_ref, pe_ref, o_ref):
    """o = x + pe on a (ts, B, D) tile; pe is (ts, 1, D) -> sublane broadcast."""
    o_ref[...] = (x_ref[...] + pe_ref[...]).astype(o_ref.dtype)


def _add_pe_dropout_kernel(x_ref, pe_ref, keep_ref, o_ref, *, inv_keep):
    """o = dropout(x + pe): keep mask is {0,1} in x.dtype, scale in f32."""
    y = x_ref[...] + pe_ref[...]
    # Multiply by the f32 scale so bf16 inputs don't pick up a systematic bias
    # from a rounded 1/(1-p); cast back once at the store.
    y = y * keep_ref[...] * jnp.float32(inv_keep)
    o_ref[...] = y.astype(o_ref.dtype)


# ----------------------------------------------------------------------------
# Per-generation tiling budget
# ----------------------------------------------------------------------------
def _tpu_kind():
    try:
        dev = jax.devices()[0]
        if dev.platform == "tpu":
            return dev.device_kind.lower()
    except Exception:
        pass
    return ""


def _tile_budget(kind):
    """Returns (target x-tile bytes, vmem_limit_bytes or None, num tensorcores)."""
    if "v7" in kind or "7x" in kind:
        # 64 MiB physical VMEM/TC: keep 2x(x+out+mask) tiles well under ~48 MiB.
        return 5 << 20, 48 << 20, 2
    if "v6" in kind:
        # 128 MiB physical: bigger tiles push the mem-bound kernel to ~95% of roofline.
        return 8 << 20, 96 << 20, 1
    if "v5" in kind:
        # 2 MiB tiles already fine at 0.82 TB/s; just raise the 16 MiB scoped default.
        return 2 << 20, 64 << 20, 1
    # Unknown / interpret: conservative.
    return 2 << 20, None, 1


def _choose_tile_rows(seq_len, row_bytes, target_bytes, num_tc):
    """Rows per S-tile.  The leading block dim has no (8,128) constraint, so the
    only hard bound is 1 <= ts <= S."""
    rows = max(1, target_bytes // max(1, row_bytes))
    rows = min(rows, seq_len)
    if num_tc > 1 and seq_len >= 2:
        # Guarantee >= 2 tiles so the "parallel" S axis feeds both v7x cores.
        rows = min(rows, pl.cdiv(seq_len, 2))
    return int(max(1, rows))


# ----------------------------------------------------------------------------
# Module-equivalent wrapper
# ----------------------------------------------------------------------------
class PositionalEncoding:
    def __init__(self, d_model, dropout=0.1, max_len=5000):
        self.d_model = d_model
        self.p = float(dropout)
        self.max_len = max_len
        position = jnp.arange(max_len, dtype=jnp.float32)[:, None]          # (L, 1)
        div_term = jnp.exp(
            jnp.arange(0, d_model, 2, dtype=jnp.float32)
            * (-math.log(10000.0) / d_model)
        )                                                                    # (D/2,)
        sin = jnp.sin(position * div_term)                                   # (L, D/2)
        cos = jnp.cos(position * div_term)                                   # (L, D/2)
        # interleave: even columns <- sin, odd columns <- cos; shape (L, 1, D)
        pe = jnp.stack([sin, cos], axis=-1).reshape(max_len, 1, d_model)
        self._pe_base = pe
        self._pe_cache = {}  # per-dtype cast cached once, reused every call

    def _pe_for(self, dtype):
        key = jnp.dtype(dtype).name
        pe = self._pe_cache.get(key)
        if pe is None:
            pe = self._pe_base.astype(dtype)
            self._pe_cache[key] = pe
        return pe

    def __call__(self, x, *, train=False, rng=None, seed=0):
        S, B, D = x.shape
        assert D == self.d_model and S <= self.max_len
        dtype = x.dtype
        itemsize = jnp.dtype(dtype).itemsize

        pe = self._pe_for(dtype)                     # (max_len, 1, D), cached

        kind = _tpu_kind()
        target_bytes, vmem_limit, num_tc = _tile_budget(kind)
        ts = _choose_tile_rows(S, B * D * itemsize, target_bytes, num_tc)
        grid = (pl.cdiv(S, ts),)

        x_spec = pl.BlockSpec((ts, B, D), lambda i: (i, 0, 0))
        pe_spec = pl.BlockSpec((ts, 1, D), lambda i: (i, 0, 0))

        use_dropout = train and self.p > 0.0
        if use_dropout:
            if rng is None:
                rng = jax.random.PRNGKey(seed)
            keep_prob = max(0.0, 1.0 - self.p)
            keep = jax.random.bernoulli(rng, keep_prob, (S, B, D)).astype(dtype)
            inv_keep = 0.0 if self.p >= 1.0 else 1.0 / (1.0 - self.p)
            kernel = functools.partial(_add_pe_dropout_kernel, inv_keep=inv_keep)
            in_specs = [x_spec, pe_spec, x_spec]
            args = (x, pe, keep)
            n_streams = 3  # x, mask in + out
            flops = 2 * S * B * D
        else:
            kernel = _add_pe_kernel
            in_specs = [x_spec, pe_spec]
            args = (x, pe)
            n_streams = 2  # x in + out
            flops = S * B * D

        cp_kwargs = dict(dimension_semantics=("parallel",))
        if vmem_limit is not None:
            cp_kwargs["vmem_limit_bytes"] = int(vmem_limit)

        bytes_accessed = n_streams * S * B * D * itemsize + S * D * itemsize

        # TODO(synk): in a training step where x is dead after this op, pass
        # input_output_aliases={0: 0} to reuse x's HBM buffer for the output.
        out = pl.pallas_call(
            kernel,
            out_shape=jax.ShapeDtypeStruct((S, B, D), dtype),
            grid=grid,
            in_specs=in_specs,
            out_specs=x_spec,
            compiler_params=pltpu.CompilerParams(**cp_kwargs),
            cost_estimate=pl.CostEstimate(
                flops=int(flops),
                transcendentals=0,
                bytes_accessed=int(bytes_accessed),
            ),
        )(*args)
        return out


# ----------------------------------------------------------------------------
# Demo / correctness check
# ----------------------------------------------------------------------------
if __name__ == "__main__":
    seq_len, batch, d_model = 8, 2, 32

    key = jax.random.PRNGKey(0)
    x = jax.random.normal(key, (seq_len, batch, d_model), dtype=jnp.float32)

    pos_enc = PositionalEncoding(d_model, dropout=0.1, max_len=5000)

    # Eval mode (dropout == identity): must match the reference.
    out = jax.block_until_ready(pos_enc(x, train=False))
    ref = x + pos_enc._pe_base[:seq_len].astype(x.dtype)   # (S,1,D) broadcast
    assert out.shape == (seq_len, batch, d_model)
    assert jnp.allclose(out, ref, atol=1e-6, rtol=1e-6), "mismatch vs reference"

    # Train mode: every element is either dropped (0) or scaled by 1/(1-p).
    out_tr = jax.block_until_ready(pos_enc(x, train=True, seed=123))
    assert out_tr.shape == (seq_len, batch, d_model)
    assert bool(jnp.all(jnp.isfinite(out_tr)))
    scaled = ref / (1.0 - 0.1)
    ok = jnp.isclose(out_tr, 0.0, atol=1e-6) | jnp.isclose(
        out_tr, scaled, atol=1e-5, rtol=1e-5
    )
    assert bool(jnp.all(ok)), "train-mode dropout values inconsistent"

    print("KERNEL_OK")
</pallas_src>

<mosaic_0001>
module attributes {stable_mosaic.version = 11 : i64} {
  func.func @_add_pe_kernel(%arg0: i32, %arg1: memref<8x2x32xf32, #tpu.memory_space<vmem>>, %arg2: memref<8x1x32xf32, #tpu.memory_space<vmem>>, %arg3: memref<8x2x32xf32, #tpu.memory_space<vmem>>) attributes {dimension_semantics = [#tpu.dimension_semantics<parallel>], iteration_bounds = array<i64: 1>, scalar_prefetch = 0 : i64, scratch_operands = 0 : i64, tpu.core_type = #tpu.core_type<tc>, window_params = [{transform_indices = @transform_0, window_bounds = array<i64: 8, 2, 32>}, {transform_indices = @transform_1, window_bounds = array<i64: 8, 1, 32>}, {transform_indices = @transform_2, window_bounds = array<i64: 8, 2, 32>}]} {
    %c0 = arith.constant 0 : index
    %c0_0 = arith.constant 0 : index
    %c0_1 = arith.constant 0 : index
    %0 = vector.load %arg1[%c0, %c0_0, %c0_1] : memref<8x2x32xf32, #tpu.memory_space<vmem>>, vector<8x2x32xf32>
    %c0_2 = arith.constant 0 : index
    %c0_3 = arith.constant 0 : index
    %c0_4 = arith.constant 0 : index
    %1 = vector.load %arg2[%c0_2, %c0_3, %c0_4] : memref<8x1x32xf32, #tpu.memory_space<vmem>>, vector<8x1x32xf32>
    %2 = vector.broadcast %1 : vector<8x1x32xf32> to vector<8x2x32xf32>
    %3 = arith.addf %0, %2 : vector<8x2x32xf32>
    %c0_5 = arith.constant 0 : index
    %c0_6 = arith.constant 0 : index
    %c0_7 = arith.constant 0 : index
    %4 = vector.load %arg3[%c0_5, %c0_6, %c0_7] : memref<8x2x32xf32, #tpu.memory_space<vmem>>, vector<8x2x32xf32>
    tpu.vector_store %arg3[%c0_5, %c0_6, %c0_7], %3 {strides = array<i32>} : memref<8x2x32xf32, #tpu.memory_space<vmem>>, vector<8x2x32xf32>,
    return
  }
  func.func @transform_0(%arg0: i32) -> (i32, i32, i32) {
    %c0_i32 = arith.constant 0 : i32
    %c0_i32_0 = arith.constant 0 : i32
    %c0_i32_1 = arith.constant 0 : i32
    return %arg0, %c0_i32, %c0_i32_0 : i32, i32, i32
  }
  func.func @transform_1(%arg0: i32) -> (i32, i32, i32) {
    %c0_i32 = arith.constant 0 : i32
    %c0_i32_0 = arith.constant 0 : i32
    %c0_i32_1 = arith.constant 0 : i32
    return %arg0, %c0_i32, %c0_i32_0 : i32, i32, i32
  }
  func.func @transform_2(%arg0: i32) -> (i32, i32, i32) {
    %c0_i32 = arith.constant 0 : i32
    %c0_i32_0 = arith.constant 0 : i32
    %c0_i32_1 = arith.constant 0 : i32
    return %arg0, %c0_i32, %c0_i32_0 : i32, i32, i32
  }
}

</mosaic_0001>

<bundles_post_ra>
// kernel: tpu_custom_call.1
= control target key start
LH: loop header
LB: loop body
LE: loop exit
PB: predicated region body
PF: predicated region fallthrough
CT: control target
= control target key end

     0   :  { %vm60_vm0 = vcmask 254976   ;;  %s201_s0 = inlined_call_operand.vmem [shape: f32[8,2,32], index: 0, kind: input, shape index: {}]   ;;  %s202_s1 = inlined_call_operand.vmem [shape: f32[5000,1,32], index: 1, kind: input, shape index: {}]   ;;  %s203_s2 = inlined_call_operand.hbm [shape: f32[8,2,32], index: 2, kind: output, shape index: {}]  }
   0x1   :  { %v12_v0 = vld [vmem:[%s201_s0] sm:$0x3]  ;;  %v13_v2 = vld [vmem:[%s201_s0 + $0x2] sm:$0x3]  ;;  %v14_v5 = vld [vmem:[%s201_s0 + $0x4] sm:$0x3] }
   0x2   :  { %v90_v1 = vld [vmem:[%s202_s1] ss:$0 sm:$0xff]  ;;  %v91_v4 = vld [vmem:[%s202_s1 + $0x1] ss:$0 sm:$0xff]  ;;  %v92_v6 = vld [vmem:[%s202_s1 + $0x2] ss:$0 sm:$0xff] }
   0x3   :  { %v52_v3 = vadd.f32 %v90_v1, %v12_v0  ;;  %v15_v7 = vld [vmem:[%s201_s0 + $0x6] sm:$0x3]  ;;  %v53_v8 = vadd.f32 %v91_v4, %v13_v2  ;;  %v93_v9 = vld [vmem:[%s202_s1 + $0x3] ss:$0 sm:$0xff]  ;;  %v16_v10 = vld [vmem:[%s201_s0 + $0x8] sm:$0x3]  ;;  %v54_v11 = vadd.f32 %v92_v6, %v14_v5 }
   0x4   :  { %v94_v12 = vld [vmem:[%s202_s1 + $0x4] ss:$0 sm:$0xff]  ;;  %v17_v13 = vld [vmem:[%s201_s0 + $0xa] sm:$0x3]  ;;  %v55_v14 = vadd.f32 %v93_v9, %v15_v7  ;;  %v95_v15 = vld [vmem:[%s202_s1 + $0x5] ss:$0 sm:$0xff] }
   0x5   :  { %61 = vst.msk [vmem:[#allocation2] sm:$0x3] %vm60_vm0, %v52_v3  ;;  %v56_v16 = vadd.f32 %v94_v12, %v16_v10  ;;  %v18_v17 = vld [vmem:[%s201_s0 + $0xc] sm:$0x3]  ;;  %v57_v18 = vadd.f32 %v95_v15, %v17_v13  ;;  %v96_v19 = vld [vmem:[%s202_s1 + $0x6] ss:$0 sm:$0xff] }
   0x6   :  { %62 = vst.msk [vmem:[#allocation2 + $0x2] sm:$0x3] %vm60_vm0, %v53_v8  ;;  %v19_v20 = vld [vmem:[%s201_s0 + $0xe] sm:$0x3]  ;;  %v97_v21 = vld [vmem:[%s202_s1 + $0x7] ss:$0 sm:$0xff]  ;;  %v58_v22 = vadd.f32 %v96_v19, %v18_v17 }
   0x7   :  { %63 = vst.msk [vmem:[#allocation2 + $0x4] sm:$0x3] %vm60_vm0, %v54_v11 }
   0x8   :  { %64 = vst.msk [vmem:[#allocation2 + $0x6] sm:$0x3] %vm60_vm0, %v55_v14 }
   0x9   :  { %65 = vst.msk [vmem:[#allocation2 + $0x8] sm:$0x3] %vm60_vm0, %v56_v16 }
   0xa   :  { %66 = vst.msk [vmem:[#allocation2 + $0xa] sm:$0x3] %vm60_vm0, %v57_v18 }
   0xb   :  { %7 = vsyncpa [#allocation3], 0  ;;  %s124_s13 = smov [#allocation2]   ;;  %s75_s17 = sshll.u32 %s203_s2, 4  ;;  %v59_v23 = vadd.f32 %v97_v21, %v19_v20  ;;  %67 = vst.msk [vmem:[#allocation2 + $0xc] sm:$0x3] %vm60_vm0, %v58_v22  ;;  %s76_s17 = int_to_ptr.hbm [resolvable:$true] %s75_s17 }
   0xc   :  { %s73_s14 = sshll.u32 %s124_s13, 4  ;;  %s125_s0 = smov 32   ;;  %s74_s14 = int_to_ptr.vmem [resolvable:$true] %s73_s14 }
   0xd   :  { %68 = vst.msk [vmem:[#allocation2 + $0xe] sm:$0x3] %vm60_vm0, %v59_v23  ;;  %s126_s18 = smov 2  }
   0xe   :  { %81 = dma.vmem_to_hbm [thread:$0]  %s74_s14, 256, %s76_s17, [#allocation3], %s125_s0, %s125_s0, %s126_s18  }
   0xf   :  { %122 = dma.done.wait [#allocation3], 256  }
  0x10   :  { %123 = vsyncadd [#allocation3], 4294967040 }
  0x11   :  { %86 = vsyncpa [#allocation3], 1 }

</bundles_post_ra>
